<compile_context>
chip_gen: v5e
topology: v5e:2x2
jax: 0.10.0
libtpu: 0.0.40
codegen_flags: <defaults>
</compile_context>

<pallas_src>
import jax
import jax.numpy as jnp
from jax.experimental import pallas as pl
from jax.experimental.pallas import tpu as pltpu


def _round_up(x, m):
    return (x + m - 1) // m * m


def cls_head_kernel(x_ref, w1_ref, b1_ref, w2_ref, b2_ref, o_ref,
                    h_acc, out_acc):
    """Grid = (batch tile i, hidden tile j, contraction tile k).

    Computes out = relu(x @ W1 + b1) @ W2 + b2 with
      h_acc   (tm, tn)     f32 : K-reduction accumulator for hidden tile j
      out_acc (tm, C_pad)  f32 : accumulator over hidden tiles j
    Both biases are folded into the accumulator inits.
    """
    j = pl.program_id(1)
    k = pl.program_id(2)
    nj = pl.num_programs(1)
    nk = pl.num_programs(2)

    # Fold b2 into the output accumulator init (first (j, k) step per batch tile).
    @pl.when((j == 0) & (k == 0))
    def _():
        out_acc[...] = jnp.broadcast_to(
            b2_ref[...].astype(jnp.float32), out_acc.shape)

    # Fold b1 into the hidden accumulator init (first K step of each hidden tile).
    @pl.when(k == 0)
    def _():
        h_acc[...] = jnp.broadcast_to(
            b1_ref[...].astype(jnp.float32), h_acc.shape)

    # Partial first matmul over this K slice (MXU, f32 accumulation).
    h_acc[...] += jnp.dot(x_ref[...], w1_ref[...],
                          preferred_element_type=jnp.float32)

    # Last K step of this hidden tile: in-place ReLU + second-matmul panel.
    @pl.when(k == nk - 1)
    def _():
        h_acc[...] = jnp.maximum(h_acc[...], 0.0)          # in-place ReLU
        out_acc[...] += jnp.dot(h_acc[...].astype(w2_ref.dtype), w2_ref[...],
                                preferred_element_type=jnp.float32)

        # Last hidden tile: lane-dense store of the finished (tm, C_pad) block.
        @pl.when(j == nj - 1)
        def _():
            o_ref[...] = out_acc[...].astype(o_ref.dtype)


def pad_cls_head_params(w1, b1, w2, b2, *, compute_dtype=None):
    """Pre-pad (and optionally downcast) the head parameters ONCE at init time.

    w1: (F, F), w2: (F, C), biases (F,)/(1,F) and (C,)/(1,C).  Zero padding is
    exact: padded hidden columns are relu(0 + 0) = 0 and padded W2 rows add 0.
    Biases stay f32 (they seed the f32 accumulators).
    """
    F = w1.shape[0]
    C = w2.shape[1]
    wdt = compute_dtype if compute_dtype is not None else w1.dtype
    F_pad = _round_up(F, 128)
    C_pad = _round_up(C, 128)
    w1p = jnp.zeros((F_pad, F_pad), wdt).at[:F, :F].set(w1.astype(wdt))
    w2p = jnp.zeros((F_pad, C_pad), wdt).at[:F, :C].set(w2.astype(wdt))
    b1p = jnp.zeros((1, F_pad), jnp.float32).at[:, :F].set(
        b1.reshape(1, -1).astype(jnp.float32))
    b2p = jnp.zeros((1, C_pad), jnp.float32).at[:, :C].set(
        b2.reshape(1, -1).astype(jnp.float32))
    return {"w1": w1p, "b1": b1p, "w2": w2p, "b2": b2p, "F": F, "C": C}


def _pick_tile(max_tile, dim_pad):
    t = min(_round_up(max_tile, 128), dim_pad)
    while dim_pad % t:
        t -= 128
    return t


def cls_head(x, params, *, tm_max=256, tk_max=512, tn_max=512):
    """x: (B, F) -> (B, C).  params from pad_cls_head_params()."""
    B, F = x.shape
    assert F == params["F"], "feature dim mismatch vs. padded params"
    C = params["C"]
    w1p, b1p, w2p, b2p = params["w1"], params["b1"], params["w2"], params["b2"]
    F_pad = w1p.shape[0]
    C_pad = w2p.shape[1]

    out_dt = x.dtype
    cdt = w1p.dtype                      # compute dtype for the MXU operands
    w_item = jnp.dtype(cdt).itemsize

    # ---- batch tile: minimize over-padding, bf16-aware sublane granularity ----
    sub = 16 if w_item == 2 else 8
    cands = [c for c in (256, 128, 64, 32, 16, 8) if c % sub == 0 and c <= tm_max]
    if not cands:
        cands = [sub]
    tm = min(cands, key=lambda c: (_round_up(B, c), -c))
    # v7x has 2 TensorCores: keep >=2 batch tiles on the "parallel" axis when
    # B allows (harmless on single-TC v5e/v6e; never increases B_pad).
    while tm > sub and _round_up(B, tm) // tm < 2:
        tm //= 2
    B_pad = _round_up(B, tm)

    # ---- contraction / hidden tiles (128-granular, 256+ preferred for v6e/v7x MXU) ----
    tk = _pick_tile(tk_max, F_pad)
    tn = _pick_tile(tn_max, F_pad)

    # Only x is padded per call; weights were padded once at init time.
    xp = jnp.zeros((B_pad, F_pad), cdt).at[:B, :F].set(x.astype(cdt))

    grid = (B_pad // tm, F_pad // tn, F_pad // tk)
    nb, nj, nk = grid

    # ---- VMEM budget (double-buffered inputs/outputs + f32 scratch) ----
    buf_bytes = 2 * (tm * tk * w_item          # x
                     + tk * tn * w_item        # W1
                     + tn * 4                  # b1 (f32)
                     + tn * C_pad * w_item     # W2
                     + C_pad * 4               # b2 (f32)
                     + tm * C_pad * jnp.dtype(out_dt).itemsize)  # out
    scratch_bytes = 4 * (tm * tn + tm * C_pad)
    vmem_limit = min(max(int(1.5 * (buf_bytes + scratch_bytes)) + (4 << 20),
                         32 << 20), 64 << 20)

    # ---- advisory cost estimate (counts re-streaming across grid tiles) ----
    flops = 2 * B_pad * F_pad * (F_pad + C_pad)
    bytes_accessed = (nj * B_pad * F_pad * w_item        # x re-read per hidden tile
                      + nb * F_pad * F_pad * w_item      # W1 re-read per batch tile
                      + nb * F_pad * C_pad * w_item      # W2 re-read per batch tile
                      + nb * (F_pad + C_pad) * 4         # biases
                      + B_pad * C_pad * jnp.dtype(out_dt).itemsize)

    out_pad = pl.pallas_call(
        cls_head_kernel,
        out_shape=jax.ShapeDtypeStruct((B_pad, C_pad), out_dt),
        grid_spec=pltpu.PrefetchScalarGridSpec(
            num_scalar_prefetch=0,
            grid=grid,
            in_specs=[
                # x: (batch tile, K tile)
                pl.BlockSpec((tm, tk), lambda i, j, k: (i, k)),
                # W1: (K tile, hidden tile)
                pl.BlockSpec((tk, tn), lambda i, j, k: (k, j)),
                # b1: hidden tile slice
                pl.BlockSpec((1, tn), lambda i, j, k: (0, j)),
                # W2: (hidden tile, full padded class dim)
                pl.BlockSpec((tn, C_pad), lambda i, j, k: (j, 0)),
                # b2: constant (tiny)
                pl.BlockSpec((1, C_pad), lambda i, j, k: (0, 0)),
            ],
            out_specs=pl.BlockSpec((tm, C_pad), lambda i, j, k: (i, 0)),
            scratch_shapes=[
                pltpu.VMEM((tm, tn), jnp.float32),      # hidden K-accumulator
                pltpu.VMEM((tm, C_pad), jnp.float32),   # output j-accumulator
            ],
        ),
        compiler_params=pltpu.CompilerParams(
            dimension_semantics=("parallel", "arbitrary", "arbitrary"),
            vmem_limit_bytes=vmem_limit,
        ),
        cost_estimate=pl.CostEstimate(
            flops=flops, transcendentals=0, bytes_accessed=bytes_accessed),
    )(xp, w1p, b1p, w2p, b2p)

    return out_pad[:B, :C]


def reference(x, w1, b1, w2, b2):
    h = jnp.maximum(x @ w1 + b1.reshape(1, -1), 0.0)
    return h @ w2 + b2.reshape(1, -1)


if __name__ == "__main__":
    # Module shapes: feat_size -> feat_size -> cls_num
    batch, feat_size, cls_num = 8, 32, 16

    key = jax.random.PRNGKey(0)
    kx, k1, kb1, k2, kb2 = jax.random.split(key, 5)

    x = jax.random.normal(kx, (batch, feat_size), dtype=jnp.float32)
    # Deterministic synthetic parameters (no checkpoint load). PyTorch nn.Linear
    # weights are stored (out, in); here we keep the (in, out) layout so the
    # kernel computes x @ W + b directly.
    w1 = jax.random.normal(k1, (feat_size, feat_size), dtype=jnp.float32) * 0.1
    b1 = jax.random.normal(kb1, (1, feat_size), dtype=jnp.float32) * 0.01
    w2 = jax.random.normal(k2, (feat_size, cls_num), dtype=jnp.float32) * 0.1
    b2 = jax.random.normal(kb2, (1, cls_num), dtype=jnp.float32) * 0.01

    # Pad/cast parameters ONCE (init time), then apply per batch.
    params = pad_cls_head_params(w1, b1, w2, b2)   # compute_dtype=jnp.bfloat16 on v6e/v7x
    out = cls_head(x, params)
    out = jax.block_until_ready(out)

    ref = reference(x, w1, b1, w2, b2)
    assert out.shape == (batch, cls_num)
    assert jnp.allclose(out, ref, atol=1e-5, rtol=1e-5), "mismatch vs reference"

    print("KERNEL_OK")
</pallas_src>

<mosaic_0001>
module attributes {stable_mosaic.version = 11 : i64} {
  func.func @cls_head_kernel(%arg0: i32, %arg1: i32, %arg2: i32, %arg3: memref<8x128xf32, #tpu.memory_space<vmem>>, %arg4: memref<128x128xf32, #tpu.memory_space<vmem>>, %arg5: memref<1x128xf32, #tpu.memory_space<vmem>>, %arg6: memref<128x128xf32, #tpu.memory_space<vmem>>, %arg7: memref<1x128xf32, #tpu.memory_space<vmem>>, %arg8: memref<8x128xf32, #tpu.memory_space<vmem>>, %arg9: memref<8x128xf32, #tpu.memory_space<vmem>>, %arg10: memref<8x128xf32, #tpu.memory_space<vmem>>) attributes {dimension_semantics = [#tpu.dimension_semantics<parallel>, #tpu.dimension_semantics<arbitrary>, #tpu.dimension_semantics<arbitrary>], iteration_bounds = array<i64: 1, 1, 1>, scalar_prefetch = 0 : i64, scratch_operands = 2 : i64, tpu.core_type = #tpu.core_type<tc>, window_params = [{transform_indices = @transform_0, window_bounds = array<i64: 8, 128>}, {transform_indices = @transform_1, window_bounds = array<i64: 128, 128>}, {transform_indices = @transform_2, window_bounds = array<i64: 1, 128>}, {transform_indices = @transform_3, window_bounds = array<i64: 128, 128>}, {pipeline_mode = #tpu.pipeline_mode<synchronous>, transform_indices = @transform_4, window_bounds = array<i64: 1, 128>}, {transform_indices = @transform_5, window_bounds = array<i64: 8, 128>}]} {
    %c0_i32 = arith.constant 0 : i32
    %0 = arith.cmpi eq, %arg1, %c0_i32 : i32
    %c0_i32_0 = arith.constant 0 : i32
    %1 = arith.cmpi eq, %arg2, %c0_i32_0 : i32
    %2 = arith.andi %0, %1 : i1
    %3 = arith.extui %2 : i1 to i32
    %c0_i32_1 = arith.constant 0 : i32
    %4 = arith.cmpi ne, %3, %c0_i32_1 : i32
    scf.if %4 {
      %c0_13 = arith.constant 0 : index
      %c0_14 = arith.constant 0 : index
      %17 = vector.load %arg7[%c0_13, %c0_14] : memref<1x128xf32, #tpu.memory_space<vmem>>, vector<1x128xf32>
      %18 = vector.shape_cast %17 : vector<1x128xf32> to vector<1x128xf32>
      %19 = vector.broadcast %18 : vector<1x128xf32> to vector<8x128xf32>
      %c0_15 = arith.constant 0 : index
      %c0_16 = arith.constant 0 : index
      %20 = vector.load %arg10[%c0_15, %c0_16] : memref<8x128xf32, #tpu.memory_space<vmem>>, vector<8x128xf32>
      tpu.vector_store %arg10[%c0_15, %c0_16], %19 {strides = array<i32>} : memref<8x128xf32, #tpu.memory_space<vmem>>, vector<8x128xf32>,
    } else {
    }
    %c0_i32_2 = arith.constant 0 : i32
    %5 = arith.cmpi eq, %arg2, %c0_i32_2 : i32
    %6 = arith.extui %5 : i1 to i32
    %c0_i32_3 = arith.constant 0 : i32
    %7 = arith.cmpi ne, %6, %c0_i32_3 : i32
    scf.if %7 {
      %c0_13 = arith.constant 0 : index
      %c0_14 = arith.constant 0 : index
      %17 = vector.load %arg5[%c0_13, %c0_14] : memref<1x128xf32, #tpu.memory_space<vmem>>, vector<1x128xf32>
      %18 = vector.shape_cast %17 : vector<1x128xf32> to vector<1x128xf32>
      %19 = vector.broadcast %18 : vector<1x128xf32> to vector<8x128xf32>
      %c0_15 = arith.constant 0 : index
      %c0_16 = arith.constant 0 : index
      %20 = vector.load %arg9[%c0_15, %c0_16] : memref<8x128xf32, #tpu.memory_space<vmem>>, vector<8x128xf32>
      tpu.vector_store %arg9[%c0_15, %c0_16], %19 {strides = array<i32>} : memref<8x128xf32, #tpu.memory_space<vmem>>, vector<8x128xf32>,
    } else {
    }
    %c0 = arith.constant 0 : index
    %c0_4 = arith.constant 0 : index
    %8 = vector.load %arg9[%c0, %c0_4] : memref<8x128xf32, #tpu.memory_space<vmem>>, vector<8x128xf32>
    %c0_5 = arith.constant 0 : index
    %c0_6 = arith.constant 0 : index
    %9 = vector.load %arg3[%c0_5, %c0_6] : memref<8x128xf32, #tpu.memory_space<vmem>>, vector<8x128xf32>
    %c0_7 = arith.constant 0 : index
    %c0_8 = arith.constant 0 : index
    %10 = vector.load %arg4[%c0_7, %c0_8] : memref<128x128xf32, #tpu.memory_space<vmem>>, vector<128x128xf32>
    %cst = arith.constant dense<0.000000e+00> : vector<8x128xf32>
    %11 = tpu.matmul %9, %10, %cst {dimension_numbers = #tpu.dot_dimension_numbers<[1], [0], [0], [1], [0, 0, 1, 1], [], []>} : vector<8x128xf32>, vector<128x128xf32>, vector<8x128xf32> -> vector<8x128xf32>
    %12 = arith.addf %8, %11 : vector<8x128xf32>
    %c0_9 = arith.constant 0 : index
    %c0_10 = arith.constant 0 : index
    %13 = vector.load %arg9[%c0_9, %c0_10] : memref<8x128xf32, #tpu.memory_space<vmem>>, vector<8x128xf32>
    tpu.vector_store %arg9[%c0_9, %c0_10], %12 {strides = array<i32>} : memref<8x128xf32, #tpu.memory_space<vmem>>, vector<8x128xf32>,
    %c0_i32_11 = arith.constant 0 : i32
    %14 = arith.cmpi eq, %arg2, %c0_i32_11 : i32
    %15 = arith.extui %14 : i1 to i32
    %c0_i32_12 = arith.constant 0 : i32
    %16 = arith.cmpi ne, %15, %c0_i32_12 : i32
    scf.if %16 {
      %c0_13 = arith.constant 0 : index
      %c0_14 = arith.constant 0 : index
      %17 = vector.load %arg9[%c0_13, %c0_14] : memref<8x128xf32, #tpu.memory_space<vmem>>, vector<8x128xf32>
      %cst_15 = arith.constant 0.000000e+00 : f32
      %18 = vector.broadcast %cst_15 : f32 to vector<8x128xf32>
      %19 = arith.maximumf %17, %18 : vector<8x128xf32>
      %c0_16 = arith.constant 0 : index
      %c0_17 = arith.constant 0 : index
      %20 = vector.load %arg9[%c0_16, %c0_17] : memref<8x128xf32, #tpu.memory_space<vmem>>, vector<8x128xf32>
      tpu.vector_store %arg9[%c0_16, %c0_17], %19 {strides = array<i32>} : memref<8x128xf32, #tpu.memory_space<vmem>>, vector<8x128xf32>,
      %c0_18 = arith.constant 0 : index
      %c0_19 = arith.constant 0 : index
      %21 = vector.load %arg10[%c0_18, %c0_19] : memref<8x128xf32, #tpu.memory_space<vmem>>, vector<8x128xf32>
      %c0_20 = arith.constant 0 : index
      %c0_21 = arith.constant 0 : index
      %22 = vector.load %arg9[%c0_20, %c0_21] : memref<8x128xf32, #tpu.memory_space<vmem>>, vector<8x128xf32>
      %c0_22 = arith.constant 0 : index
      %c0_23 = arith.constant 0 : index
      %23 = vector.load %arg6[%c0_22, %c0_23] : memref<128x128xf32, #tpu.memory_space<vmem>>, vector<128x128xf32>
      %cst_24 = arith.constant dense<0.000000e+00> : vector<8x128xf32>
      %24 = tpu.matmul %22, %23, %cst_24 {dimension_numbers = #tpu.dot_dimension_numbers<[1], [0], [0], [1], [0, 0, 1, 1], [], []>} : vector<8x128xf32>, vector<128x128xf32>, vector<8x128xf32> -> vector<8x128xf32>
      %25 = arith.addf %21, %24 : vector<8x128xf32>
      %c0_25 = arith.constant 0 : index
      %c0_26 = arith.constant 0 : index
      %26 = vector.load %arg10[%c0_25, %c0_26] : memref<8x128xf32, #tpu.memory_space<vmem>>, vector<8x128xf32>
      tpu.vector_store %arg10[%c0_25, %c0_26], %25 {strides = array<i32>} : memref<8x128xf32, #tpu.memory_space<vmem>>, vector<8x128xf32>,
      %c0_i32_27 = arith.constant 0 : i32
      %27 = arith.cmpi eq, %arg1, %c0_i32_27 : i32
      %28 = arith.extui %27 : i1 to i32
      %c0_i32_28 = arith.constant 0 : i32
      %29 = arith.cmpi ne, %28, %c0_i32_28 : i32
      scf.if %29 {
        %c0_29 = arith.constant 0 : index
        %c0_30 = arith.constant 0 : index
        %30 = vector.load %arg10[%c0_29, %c0_30] : memref<8x128xf32, #tpu.memory_space<vmem>>, vector<8x128xf32>
        %c0_31 = arith.constant 0 : index
        %c0_32 = arith.constant 0 : index
        %31 = vector.load %arg8[%c0_31, %c0_32] : memref<8x128xf32, #tpu.memory_space<vmem>>, vector<8x128xf32>
        tpu.vector_store %arg8[%c0_31, %c0_32], %30 {strides = array<i32>} : memref<8x128xf32, #tpu.memory_space<vmem>>, vector<8x128xf32>,
      } else {
      }
    } else {
    }
    return
  }
  func.func @transform_0(%arg0: i32, %arg1: i32, %arg2: i32) -> (i32, i32) {
    %c0_i32 = arith.constant 0 : i32
    return %arg0, %arg2 : i32, i32
  }
  func.func @transform_1(%arg0: i32, %arg1: i32, %arg2: i32) -> (i32, i32) {
    %c0_i32 = arith.constant 0 : i32
    return %arg2, %arg1 : i32, i32
  }
  func.func @transform_2(%arg0: i32, %arg1: i32, %arg2: i32) -> (i32, i32) {
    %c0_i32 = arith.constant 0 : i32
    %c0_i32_0 = arith.constant 0 : i32
    return %c0_i32, %arg1 : i32, i32
  }
  func.func @transform_3(%arg0: i32, %arg1: i32, %arg2: i32) -> (i32, i32) {
    %c0_i32 = arith.constant 0 : i32
    %c0_i32_0 = arith.constant 0 : i32
    return %arg1, %c0_i32 : i32, i32
  }
  func.func @transform_4(%arg0: i32, %arg1: i32, %arg2: i32) -> (i32, i32) {
    %c0_i32 = arith.constant 0 : i32
    %c0_i32_0 = arith.constant 0 : i32
    %c0_i32_1 = arith.constant 0 : i32
    return %c0_i32, %c0_i32_0 : i32, i32
  }
  func.func @transform_5(%arg0: i32, %arg1: i32, %arg2: i32) -> (i32, i32) {
    %c0_i32 = arith.constant 0 : i32
    %c0_i32_0 = arith.constant 0 : i32
    return %arg0, %c0_i32 : i32, i32
  }
}

</mosaic_0001>

<bundles_post_ra>
// kernel: tpu_custom_call.1
= control target key start
LH: loop header
LB: loop body
LE: loop exit
PB: predicated region body
PF: predicated region fallthrough
CT: control target
= control target key end

     0   :  { %10 = vsyncpa [#allocation5], 0  ;;  %s358_s0 = inlined_call_operand.hbm [shape: f32[8,128], index: 0, kind: input, shape index: {}]   ;;  %s359_s1 = inlined_call_operand.hbm [shape: f32[128,128], index: 1, kind: input, shape index: {}]   ;;  %s360_s2 = inlined_call_operand.vmem [shape: f32[1,128], index: 2, kind: input, shape index: {}]   ;;  %s361_s3 = inlined_call_operand.hbm [shape: f32[128,128], index: 3, kind: input, shape index: {}]   ;;  %s362_s4 = inlined_call_operand.vmem [shape: f32[1,128], index: 4, kind: input, shape index: {}]   ;;  %s363_s5 = inlined_call_operand.hbm [shape: f32[8,128], index: 5, kind: output, shape index: {}]  }
   0x1   :  { %11 = vsyncpa [#allocation8], 0  ;;  %s28_s20 = sshll.u32 %s359_s1, 4  ;;  %s29_s20 = int_to_ptr.hbm [resolvable:$true] %s28_s20 }
   0x2   :  { %12 = vsyncpa [#allocation6], 0  ;;  %s304_s21 = smov [#allocation7]   ;;  %s18_s25 = sshll.u32 %s358_s0, 4  ;;  %s19_s25 = int_to_ptr.hbm [resolvable:$true] %s18_s25 }
   0x3   :  { %s30_s22 = sshll.u32 %s304_s21, 4  ;;  %s305_s26 = smov 128   ;;  %s31_s22 = int_to_ptr.vmem [resolvable:$true] %s30_s22 }
   0x4   :  { %s306_s27 = smov 8   ;;  %s307_s28 = smov [#allocation4]  }
   0x5   :  { %36 = dma.hbm_to_vmem [thread:$0]  %s29_s20, 2048, %s31_s22, [#allocation8], %s305_s26, %s305_s26, %s306_s27  }
   0x6   :  { %s20_s29 = sshll.u32 %s307_s28, 4  ;;  %s43_s7 = sshll.u32 %s361_s3, 4  ;;  %s21_s29 = int_to_ptr.vmem [resolvable:$true] %s20_s29  ;;  %s44_s7 = int_to_ptr.hbm [resolvable:$true] %s43_s7 }
   0x7   :  { %23 = dma.hbm_to_vmem [thread:$0]  %s19_s25, 128, %s21_s29, [#allocation5]  }
   0x8   :  { %s308_s1 = smov [#allocation9]  }
   0x9   :  { %s45_s8 = sshll.u32 %s308_s1, 4  ;;  %s46_s8 = int_to_ptr.vmem [resolvable:$true] %s45_s8 }
   0xa   :  { %51 = dma.hbm_to_vmem [thread:$0]  %s44_s7, 2048, %s46_s8, [#allocation8], %s305_s26, %s305_s26, %s306_s27  }
   0xb   :  { %298 = dma.done.wait [#allocation5], 128  }
   0xc   :  { %299 = vsyncadd [#allocation5], 4294967168 }
   0xd   :  { %300 = dma.done.wait [#allocation8], 4096  }
   0xe   :  { %301 = vsyncadd [#allocation8], 4294963200  ;;  %v102_v0 = vld [vmem:[#allocation7 + $0x78] sm:$0xff]  ;;  %v101_v1 = vld [vmem:[#allocation7 + $0x70] sm:$0xff]  ;;  %s309_s11 = smov [#allocation10]   ;;  %s183_s15 = sshll.u32 %s363_s5, 4  ;;  %s184_s15 = int_to_ptr.hbm [resolvable:$true] %s183_s15 }
   0xf   :  { %103 = vmatpush.msra.mxu0 %v102_v0  ;;  %v100_v2 = vld [vmem:[#allocation7 + $0x68] sm:$0xff]  ;;  %v99_v3 = vld [vmem:[#allocation7 + $0x60] sm:$0xff]  ;;  %v148_v4 = vld [vmem:[#allocation9 + $0x78] sm:$0xff]  ;;  %s181_s12 = sshll.u32 %s309_s11, 4  ;;  %s182_s12 = int_to_ptr.vmem [resolvable:$true] %s181_s12 }
  0x10   :  { %v98_v5 = vld [vmem:[#allocation7 + $0x58] sm:$0xff]  ;;  %149 = vmatpush.msra.mxu1 %v148_v4  ;;  %v147_v6 = vld [vmem:[#allocation9 + $0x70] sm:$0xff]  ;;  %v146_v7 = vld [vmem:[#allocation9 + $0x68] sm:$0xff] }
  0x11   :  { %104 = vmatpush.msra.mxu0 %v101_v1  ;;  %v97_v8 = vld [vmem:[#allocation7 + $0x50] sm:$0xff]  ;;  %v145_v9 = vld [vmem:[#allocation9 + $0x60] sm:$0xff]  ;;  %v96_v10 = vld [vmem:[#allocation7 + $0x48] sm:$0xff] }
  0x12   :  { %150 = vmatpush.msra.mxu1 %v147_v6  ;;  %v144_v11 = vld [vmem:[#allocation9 + $0x58] sm:$0xff]  ;;  %v95_v12 = vld [vmem:[#allocation7 + $0x40] sm:$0xff]  ;;  %v143_v13 = vld [vmem:[#allocation9 + $0x50] sm:$0xff] }
  0x13   :  { %105 = vmatpush.msra.mxu0 %v100_v2  ;;  %v94_v14 = vld [vmem:[#allocation7 + $0x38] sm:$0xff]  ;;  %v142_v15 = vld [vmem:[#allocation9 + $0x48] sm:$0xff]  ;;  %v93_v16 = vld [vmem:[#allocation7 + $0x30] sm:$0xff] }
  0x14   :  { %151 = vmatpush.msra.mxu1 %v146_v7  ;;  %v141_v17 = vld [vmem:[#allocation9 + $0x40] sm:$0xff]  ;;  %v92_v18 = vld [vmem:[#allocation7 + $0x28] sm:$0xff]  ;;  %v140_v19 = vld [vmem:[#allocation9 + $0x38] sm:$0xff] }
  0x15   :  { %106 = vmatpush.msra.mxu0 %v99_v3  ;;  %v91_v20 = vld [vmem:[#allocation7 + $0x20] sm:$0xff]  ;;  %v139_v21 = vld [vmem:[#allocation9 + $0x30] sm:$0xff]  ;;  %v90_v22 = vld [vmem:[#allocation7 + $0x18] sm:$0xff] }
  0x16   :  { %152 = vmatpush.msra.mxu1 %v145_v9  ;;  %v138_v23 = vld [vmem:[#allocation9 + $0x28] sm:$0xff]  ;;  %v89_v24 = vld [vmem:[#allocation7 + $0x10] sm:$0xff]  ;;  %v137_v25 = vld [vmem:[#allocation9 + $0x20] sm:$0xff] }
  0x17   :  { %107 = vmatpush.msra.mxu0 %v98_v5  ;;  %v88_v26 = vld [vmem:[#allocation7 + $0x8] sm:$0xff]  ;;  %v136_v27 = vld [vmem:[#allocation9 + $0x18] sm:$0xff]  ;;  %v87_v28 = vld [vmem:[#allocation7] sm:$0xff] }
  0x18   :  { %153 = vmatpush.msra.mxu1 %v144_v11  ;;  %v86_v29 = vld [vmem:[#allocation4] sm:$0xff]  ;;  %v135_v30 = vld [vmem:[#allocation9 + $0x10] sm:$0xff]  ;;  %v134_v31 = vld [vmem:[#allocation9 + $0x8] sm:$0xff] }
  0x19   :  { %108 = vmatpush.msra.mxu0 %v97_v8  ;;  %v133_v32 = vld [vmem:[#allocation9] sm:$0xff]  ;;  %v200_v33 = vld [vmem:[%s360_s2] ss:$0 sm:$0xff] }
  0x1a   :  { %154 = vmatpush.msra.mxu1 %v143_v13  ;;  %v201_v37 = vld [vmem:[%s362_s4] ss:$0 sm:$0xff] }
  0x1b   :  { %109 = vmatpush.msra.mxu0 %v96_v10 }
  0x1c   :  { %155 = vmatpush.msra.mxu1 %v142_v15 }
  0x1d   :  { %110 = vmatpush.msra.mxu0 %v95_v12 }
  0x1e   :  { %156 = vmatpush.msra.mxu1 %v141_v17 }
  0x1f   :  { %111 = vmatpush.msra.mxu0 %v94_v14 }
  0x20   :  { %157 = vmatpush.msra.mxu1 %v140_v19 }
  0x21   :  { %112 = vmatpush.msra.mxu0 %v93_v16 }
  0x22   :  { %158 = vmatpush.msra.mxu1 %v139_v21 }
  0x23   :  { %113 = vmatpush.msra.mxu0 %v92_v18 }
  0x24   :  { %159 = vmatpush.msra.mxu1 %v138_v23 }
  0x25   :  { %114 = vmatpush.msra.mxu0 %v91_v20 }
  0x26   :  { %160 = vmatpush.msra.mxu1 %v137_v25 }
  0x27   :  { %115 = vmatpush.msra.mxu0 %v90_v22 }
  0x28   :  { %161 = vmatpush.msra.mxu1 %v136_v27 }
  0x29   :  { %116 = vmatpush.msra.mxu0 %v89_v24 }
  0x2a   :  { %162 = vmatpush.msra.mxu1 %v135_v30 }
  0x2b   :  { %117 = vmatpush.msra.mxu0 %v88_v26 }
  0x2c   :  { %163 = vmatpush.msra.mxu1 %v134_v31 }
  0x2d   :  { %118 = vmatpush.msra.mxu0 %v87_v28 }
  0x2e   :  { %119 = vmatmul.f32.vlgmr.msra.gmra.mxu0 %v86_v29  ;;  %164 = vmatpush.msra.mxu1 %v133_v32 }
  0xab   :  { %v120_v34 = vpop.f32.mrf.mxu0 }
  0xac   :  { %v123_v35 = vadd.f32 %v200_v33, %v120_v34 }
  0xae   :  { %v129_v36 = vmax.f32 %v123_v35, 0.0 }
  0xb0   :  { %165 = vmatmul.f32.vlgmr.msra.gmra.mxu1 %v129_v36 }
 0x12d   :  { %v166_v38 = vpop.f32.mrf.mxu1 }
 0x12e   :  { %v169_v39 = vadd.f32 %v201_v37, %v166_v38 }
 0x130   :  { %175 = vst [vmem:[#allocation10] sm:$0xff] %v169_v39 }
 0x131   :  { %186 = dma.vmem_to_hbm [thread:$0]  %s182_s12, 128, %s184_s15, [#allocation6]  }
 0x132   :  { %302 = dma.done.wait [#allocation6], 128  }
 0x133   :  { %303 = vsyncadd [#allocation6], 4294967168 }
 0x134   :  { %191 = vsyncpa [#allocation5], 1 }
 0x135   :  { %192 = vsyncpa [#allocation8], 1 }
 0x136   :  { %193 = vsyncpa [#allocation6], 1 }

</bundles_post_ra>
